<compile_context>
chip_gen: v5e
topology: v5e:2x2
jax: 0.10.0
libtpu: 0.0.40
codegen_flags: <defaults>
</compile_context>

<pallas_src>
import functools

import jax
import jax.numpy as jnp
from jax.experimental import pallas as pl
from jax.experimental.pallas import tpu as pltpu


def _round_up(n, m):
    return ((n + m - 1) // m) * m


def _pad2d(x, rows, cols):
    return jnp.pad(x, ((0, rows - x.shape[0]), (0, cols - x.shape[1])))


def cvae_kernel(c_ref, eps_ref,
                w_enc_ref, b_enc_ref,
                w_heads_ref, b_heads_ref,
                w_dec_ref, b_dec_ref,
                w_out_ref, b_out_ref,
                heads_ref, recon_ref,
                *, lat_pad):
    cd = w_enc_ref.dtype  # MXU input dtype (bf16)

    c = c_ref[...]        # (TILE_B, cond_pad) bf16 (pre-cast in wrapper)
    eps = eps_ref[...]    # (TILE_B, lat_pad)  f32, zero in padded lanes

    # encoder: h = relu(c @ W_enc + b_enc)   (bf16 MXU inputs, f32 accumulation)
    h = jnp.dot(c, w_enc_ref[...], preferred_element_type=jnp.float32)
    h = jnp.maximum(h + b_enc_ref[...], 0.0)

    # fused mu|logvar head: one wide matmul; each half is 128-lane aligned so
    # the slices below are free (no cross-lane moves).
    heads = jnp.dot(h.astype(cd), w_heads_ref[...],
                    preferred_element_type=jnp.float32) + b_heads_ref[...]
    mu = heads[:, :lat_pad]
    lv = heads[:, lat_pad:]

    # reparameterization: z = mu + eps * exp(0.5 * lv)   (exp -> EUP slot)
    # padded lanes: mu=0, lv=0 -> exp=1, eps=0 -> z=0, so decoder sees zeros there.
    z = mu + eps * jnp.exp(0.5 * lv)

    # decoder: recon = relu(z @ W_dec + b_dec) @ W_out + b_out
    dh = jnp.dot(z.astype(cd), w_dec_ref[...], preferred_element_type=jnp.float32)
    dh = jnp.maximum(dh + b_dec_ref[...], 0.0)
    recon = jnp.dot(dh.astype(cd), w_out_ref[...],
                    preferred_element_type=jnp.float32) + b_out_ref[...]

    # lane-dense full-width stores; wrapper strips the zero padding
    heads_ref[...] = heads.astype(heads_ref.dtype)
    recon_ref[...] = recon.astype(recon_ref.dtype)


def cvae_forward(c, eps, params, *, tile_b=32):
    """params: transposed weights [in, out] (bf16) and biases [1, out] (f32)."""
    B, cond_dim = c.shape
    latent_dim = eps.shape[1]
    hid_dim = params["w_enc"].shape[1]
    out_dim = params["w_out"].shape[1]

    assert tile_b % 8 == 0, "tile_b must be a multiple of 8 sublanes"

    # --- wrapper-side layout glue: pad every feature dim to 128 lanes ---------
    cond_pad = _round_up(cond_dim, 128)
    hid_pad = _round_up(hid_dim, 128)
    lat_pad = _round_up(latent_dim, 128)
    out_pad = _round_up(out_dim, 128)
    heads_pad = 2 * lat_pad  # [mu (lat_pad) | lv (lat_pad)], both tile-aligned

    w_enc = _pad2d(params["w_enc"], cond_pad, hid_pad)
    b_enc = _pad2d(params["b_enc"], 1, hid_pad)
    w_heads = jnp.concatenate(
        [_pad2d(params["w_mu"], hid_pad, lat_pad),
         _pad2d(params["w_lv"], hid_pad, lat_pad)], axis=1)
    b_heads = jnp.concatenate(
        [_pad2d(params["b_mu"], 1, lat_pad),
         _pad2d(params["b_lv"], 1, lat_pad)], axis=1)
    w_dec = _pad2d(params["w_dec"], lat_pad, hid_pad)
    b_dec = _pad2d(params["b_dec"], 1, hid_pad)
    w_out = _pad2d(params["w_out"], hid_pad, out_pad)
    b_out = _pad2d(params["b_out"], 1, out_pad)
    weights = (w_enc, b_enc, w_heads, b_heads, w_dec, b_dec, w_out, b_out)

    # pad batch to a multiple of tile_b; cast c to bf16 (it only feeds the MXU)
    b_padded = _round_up(B, tile_b)
    c_p = _pad2d(c.astype(jnp.bfloat16), b_padded, cond_pad)
    eps_p = _pad2d(eps.astype(jnp.float32), b_padded, lat_pad)

    grid = (b_padded // tile_b,)

    def act_spec(d):
        return pl.BlockSpec((tile_b, d), lambda i: (i, 0))

    def resident_spec(x):
        # constant block index + single buffer: one VMEM copy, resident across
        # all batch tiles (critical under v7x's 64 MiB VMEM at production dims)
        return pl.BlockSpec(x.shape, lambda i: (0, 0),
                            pipeline_mode=pl.Buffered(1))

    # --- VMEM budget: single-buffered params + double-buffered activation tiles
    param_bytes = sum(int(x.size) * x.dtype.itemsize for x in weights)
    act_tile_bytes = tile_b * (cond_pad * 2 + lat_pad * 4
                               + heads_pad * 4 + out_pad * 2)
    vmem_limit = int(1.25 * (param_bytes + 2 * act_tile_bytes))
    vmem_limit = min(max(vmem_limit, 32 << 20), 64 << 20)

    # advisory scheduling hint for XLA around the custom call
    flops = 2 * b_padded * (cond_pad * hid_pad + hid_pad * heads_pad
                            + lat_pad * hid_pad + hid_pad * out_pad)
    bytes_accessed = (param_bytes
                      + int(c_p.size) * 2 + int(eps_p.size) * 4
                      + b_padded * (heads_pad * 4 + out_pad * 2))

    heads_out, recon_out = pl.pallas_call(
        functools.partial(cvae_kernel, lat_pad=lat_pad),
        out_shape=(
            jax.ShapeDtypeStruct((b_padded, heads_pad), jnp.float32),   # mu|lv
            jax.ShapeDtypeStruct((b_padded, out_pad), jnp.bfloat16),    # recon
        ),
        grid=grid,
        in_specs=[
            act_spec(cond_pad),        # c
            act_spec(lat_pad),         # eps
            *(resident_spec(w) for w in weights),
        ],
        out_specs=(
            pl.BlockSpec((tile_b, heads_pad), lambda i: (i, 0)),
            pl.BlockSpec((tile_b, out_pad), lambda i: (i, 0)),
        ),
        compiler_params=pltpu.CompilerParams(
            dimension_semantics=("parallel",),
            vmem_limit_bytes=vmem_limit),
        cost_estimate=pl.CostEstimate(
            flops=flops,
            transcendentals=b_padded * lat_pad,
            bytes_accessed=bytes_accessed),
    )(c_p, eps_p, *weights)

    mu = heads_out[:B, :latent_dim]
    lv = heads_out[:B, lat_pad:lat_pad + latent_dim]
    recon = recon_out[:B, :out_dim].astype(jnp.float32)
    return recon, mu, lv


def init_params(key, cond_dim, hid_dim, latent_dim, out_dim,
                *, weight_dtype=jnp.bfloat16):
    """Deterministic synthetic init; weights stored as [in, out] (bf16), biases f32."""
    # TODO(synk): on v7x, weight_dtype=fp8 (e4m3) halves weight VMEM/HBM traffic;
    # not a drop-in on v5e/v6e, so bf16 is the portable default here.
    ks = jax.random.split(key, 10)

    def lin(kw, kb, fan_in, fan_out):
        w = (jax.random.normal(kw, (fan_in, fan_out), jnp.float32) * 0.1).astype(weight_dtype)
        b = jax.random.normal(kb, (1, fan_out), jnp.float32) * 0.01
        return w, b

    w_enc, b_enc = lin(ks[0], ks[1], cond_dim, hid_dim)
    w_mu, b_mu = lin(ks[2], ks[3], hid_dim, latent_dim)
    w_lv, b_lv = lin(ks[4], ks[5], hid_dim, latent_dim)
    w_dec, b_dec = lin(ks[6], ks[7], latent_dim, hid_dim)
    w_out, b_out = lin(ks[8], ks[9], hid_dim, out_dim)
    return dict(w_enc=w_enc, b_enc=b_enc, w_mu=w_mu, b_mu=b_mu,
                w_lv=w_lv, b_lv=b_lv, w_dec=w_dec, b_dec=b_dec,
                w_out=w_out, b_out=b_out)


def reference_forward(c, eps, p):
    """Pure-JAX f32 reference using the same (bf16-stored) weights."""
    f32 = lambda w: w.astype(jnp.float32)
    h = jnp.maximum(c @ f32(p["w_enc"]) + p["b_enc"], 0.0)
    mu = h @ f32(p["w_mu"]) + p["b_mu"]
    lv = h @ f32(p["w_lv"]) + p["b_lv"]
    z = mu + eps * jnp.exp(0.5 * lv)
    dh = jnp.maximum(z @ f32(p["w_dec"]) + p["b_dec"], 0.0)
    recon = dh @ f32(p["w_out"]) + p["b_out"]
    return recon, mu, lv


if __name__ == "__main__":
    B, cond_dim, hid_dim, latent_dim, out_dim = 64, 16, 32, 8, 16
    # grid of exactly 2 batch tiles: minimal per-step overhead at this toy size
    # while still letting v7x's 2 TensorCores each take one tile.
    TILE_B = 32

    key = jax.random.PRNGKey(0)
    k_params, k_c, k_eps = jax.random.split(key, 3)

    params = init_params(k_params, cond_dim, hid_dim, latent_dim, out_dim)
    c = jax.random.normal(k_c, (B, cond_dim), jnp.float32)
    # torch.randn_like(std) -> standard normal noise, generated as wrapper glue
    eps = jax.random.normal(k_eps, (B, latent_dim), jnp.float32)

    recon, mu, lv = jax.block_until_ready(cvae_forward(c, eps, params, tile_b=TILE_B))

    # sanity-check against a pure-JAX f32 reference of the same math;
    # tolerance loosened because the kernel runs bf16 MXU inputs (and a bf16
    # recon output) with f32 accumulation.
    r_ref, mu_ref, lv_ref = reference_forward(c, eps, params)
    assert jnp.allclose(mu, mu_ref, atol=5e-2, rtol=5e-2)
    assert jnp.allclose(lv, lv_ref, atol=5e-2, rtol=5e-2)
    assert jnp.allclose(recon, r_ref, atol=5e-2, rtol=5e-2)

    print("KERNEL_OK")
</pallas_src>

<mosaic_0001>
module attributes {stable_mosaic.version = 11 : i64} {
  func.func @cvae_kernel(%arg0: i32, %arg1: memref<32x128xbf16, #tpu.memory_space<vmem>>, %arg2: memref<32x128xf32, #tpu.memory_space<vmem>>, %arg3: memref<128x128xbf16, #tpu.memory_space<vmem>>, %arg4: memref<1x128xf32, #tpu.memory_space<vmem>>, %arg5: memref<128x256xbf16, #tpu.memory_space<vmem>>, %arg6: memref<1x256xf32, #tpu.memory_space<vmem>>, %arg7: memref<128x128xbf16, #tpu.memory_space<vmem>>, %arg8: memref<1x128xf32, #tpu.memory_space<vmem>>, %arg9: memref<128x128xbf16, #tpu.memory_space<vmem>>, %arg10: memref<1x128xf32, #tpu.memory_space<vmem>>, %arg11: memref<32x256xf32, #tpu.memory_space<vmem>>, %arg12: memref<32x128xbf16, #tpu.memory_space<vmem>>) attributes {dimension_semantics = [#tpu.dimension_semantics<parallel>], iteration_bounds = array<i64: 2>, scalar_prefetch = 0 : i64, scratch_operands = 0 : i64, tpu.core_type = #tpu.core_type<tc>, window_params = [{transform_indices = @transform_0, window_bounds = array<i64: 32, 128>}, {transform_indices = @transform_1, window_bounds = array<i64: 32, 128>}, {pipeline_mode = #tpu.pipeline_mode<synchronous>, transform_indices = @transform_2, window_bounds = array<i64: 128, 128>}, {pipeline_mode = #tpu.pipeline_mode<synchronous>, transform_indices = @transform_3, window_bounds = array<i64: 1, 128>}, {pipeline_mode = #tpu.pipeline_mode<synchronous>, transform_indices = @transform_4, window_bounds = array<i64: 128, 256>}, {pipeline_mode = #tpu.pipeline_mode<synchronous>, transform_indices = @transform_5, window_bounds = array<i64: 1, 256>}, {pipeline_mode = #tpu.pipeline_mode<synchronous>, transform_indices = @transform_6, window_bounds = array<i64: 128, 128>}, {pipeline_mode = #tpu.pipeline_mode<synchronous>, transform_indices = @transform_7, window_bounds = array<i64: 1, 128>}, {pipeline_mode = #tpu.pipeline_mode<synchronous>, transform_indices = @transform_8, window_bounds = array<i64: 128, 128>}, {pipeline_mode = #tpu.pipeline_mode<synchronous>, transform_indices = @transform_9, window_bounds = array<i64: 1, 128>}, {transform_indices = @transform_10, window_bounds = array<i64: 32, 256>}, {transform_indices = @transform_11, window_bounds = array<i64: 32, 128>}]} {
    %c0 = arith.constant 0 : index
    %c0_0 = arith.constant 0 : index
    %0 = vector.load %arg1[%c0, %c0_0] : memref<32x128xbf16, #tpu.memory_space<vmem>>, vector<32x128xbf16>
    %c0_1 = arith.constant 0 : index
    %c0_2 = arith.constant 0 : index
    %1 = vector.load %arg2[%c0_1, %c0_2] : memref<32x128xf32, #tpu.memory_space<vmem>>, vector<32x128xf32>
    %c0_3 = arith.constant 0 : index
    %c0_4 = arith.constant 0 : index
    %2 = vector.load %arg3[%c0_3, %c0_4] : memref<128x128xbf16, #tpu.memory_space<vmem>>, vector<128x128xbf16>
    %cst = arith.constant dense<0.000000e+00> : vector<32x128xf32>
    %3 = tpu.matmul %0, %2, %cst {dimension_numbers = #tpu.dot_dimension_numbers<[1], [0], [0], [1], [0, 0, 1, 1], [], []>} : vector<32x128xbf16>, vector<128x128xbf16>, vector<32x128xf32> -> vector<32x128xf32>
    %c0_5 = arith.constant 0 : index
    %c0_6 = arith.constant 0 : index
    %4 = vector.load %arg4[%c0_5, %c0_6] : memref<1x128xf32, #tpu.memory_space<vmem>>, vector<1x128xf32>
    %5 = vector.broadcast %4 : vector<1x128xf32> to vector<32x128xf32>
    %6 = arith.addf %3, %5 : vector<32x128xf32>
    %cst_7 = arith.constant 0.000000e+00 : f32
    %7 = vector.broadcast %cst_7 : f32 to vector<32x128xf32>
    %8 = arith.maximumf %6, %7 : vector<32x128xf32>
    %9 = arith.truncf %8 : vector<32x128xf32> to vector<32x128xbf16>
    %c0_8 = arith.constant 0 : index
    %c0_9 = arith.constant 0 : index
    %10 = vector.load %arg5[%c0_8, %c0_9] : memref<128x256xbf16, #tpu.memory_space<vmem>>, vector<128x256xbf16>
    %cst_10 = arith.constant dense<0.000000e+00> : vector<32x256xf32>
    %11 = tpu.matmul %9, %10, %cst_10 {dimension_numbers = #tpu.dot_dimension_numbers<[1], [0], [0], [1], [0, 0, 1, 1], [], []>} : vector<32x128xbf16>, vector<128x256xbf16>, vector<32x256xf32> -> vector<32x256xf32>
    %c0_11 = arith.constant 0 : index
    %c0_12 = arith.constant 0 : index
    %12 = vector.load %arg6[%c0_11, %c0_12] : memref<1x256xf32, #tpu.memory_space<vmem>>, vector<1x256xf32>
    %13 = vector.broadcast %12 : vector<1x256xf32> to vector<32x256xf32>
    %14 = arith.addf %11, %13 : vector<32x256xf32>
    %15 = vector.extract_strided_slice %14 {offsets = [0, 0], sizes = [32, 128], strides = [1, 1]} : vector<32x256xf32> to vector<32x128xf32>
    %16 = vector.extract_strided_slice %14 {offsets = [0, 128], sizes = [32, 128], strides = [1, 1]} : vector<32x256xf32> to vector<32x128xf32>
    %cst_13 = arith.constant 5.000000e-01 : f32
    %17 = vector.broadcast %cst_13 : f32 to vector<32x128xf32>
    %18 = arith.mulf %17, %16 : vector<32x128xf32>
    %19 = math.exp %18 : vector<32x128xf32>
    %20 = arith.mulf %1, %19 : vector<32x128xf32>
    %21 = arith.addf %15, %20 : vector<32x128xf32>
    %22 = arith.truncf %21 : vector<32x128xf32> to vector<32x128xbf16>
    %c0_14 = arith.constant 0 : index
    %c0_15 = arith.constant 0 : index
    %23 = vector.load %arg7[%c0_14, %c0_15] : memref<128x128xbf16, #tpu.memory_space<vmem>>, vector<128x128xbf16>
    %cst_16 = arith.constant dense<0.000000e+00> : vector<32x128xf32>
    %24 = tpu.matmul %22, %23, %cst_16 {dimension_numbers = #tpu.dot_dimension_numbers<[1], [0], [0], [1], [0, 0, 1, 1], [], []>} : vector<32x128xbf16>, vector<128x128xbf16>, vector<32x128xf32> -> vector<32x128xf32>
    %c0_17 = arith.constant 0 : index
    %c0_18 = arith.constant 0 : index
    %25 = vector.load %arg8[%c0_17, %c0_18] : memref<1x128xf32, #tpu.memory_space<vmem>>, vector<1x128xf32>
    %26 = vector.broadcast %25 : vector<1x128xf32> to vector<32x128xf32>
    %27 = arith.addf %24, %26 : vector<32x128xf32>
    %cst_19 = arith.constant 0.000000e+00 : f32
    %28 = vector.broadcast %cst_19 : f32 to vector<32x128xf32>
    %29 = arith.maximumf %27, %28 : vector<32x128xf32>
    %30 = arith.truncf %29 : vector<32x128xf32> to vector<32x128xbf16>
    %c0_20 = arith.constant 0 : index
    %c0_21 = arith.constant 0 : index
    %31 = vector.load %arg9[%c0_20, %c0_21] : memref<128x128xbf16, #tpu.memory_space<vmem>>, vector<128x128xbf16>
    %cst_22 = arith.constant dense<0.000000e+00> : vector<32x128xf32>
    %32 = tpu.matmul %30, %31, %cst_22 {dimension_numbers = #tpu.dot_dimension_numbers<[1], [0], [0], [1], [0, 0, 1, 1], [], []>} : vector<32x128xbf16>, vector<128x128xbf16>, vector<32x128xf32> -> vector<32x128xf32>
    %c0_23 = arith.constant 0 : index
    %c0_24 = arith.constant 0 : index
    %33 = vector.load %arg10[%c0_23, %c0_24] : memref<1x128xf32, #tpu.memory_space<vmem>>, vector<1x128xf32>
    %34 = vector.broadcast %33 : vector<1x128xf32> to vector<32x128xf32>
    %35 = arith.addf %32, %34 : vector<32x128xf32>
    %c0_25 = arith.constant 0 : index
    %c0_26 = arith.constant 0 : index
    %36 = vector.load %arg11[%c0_25, %c0_26] : memref<32x256xf32, #tpu.memory_space<vmem>>, vector<32x256xf32>
    tpu.vector_store %arg11[%c0_25, %c0_26], %14 {strides = array<i32>} : memref<32x256xf32, #tpu.memory_space<vmem>>, vector<32x256xf32>,
    %37 = arith.truncf %35 : vector<32x128xf32> to vector<32x128xbf16>
    %c0_27 = arith.constant 0 : index
    %c0_28 = arith.constant 0 : index
    %38 = vector.load %arg12[%c0_27, %c0_28] : memref<32x128xbf16, #tpu.memory_space<vmem>>, vector<32x128xbf16>
    tpu.vector_store %arg12[%c0_27, %c0_28], %37 {strides = array<i32>} : memref<32x128xbf16, #tpu.memory_space<vmem>>, vector<32x128xbf16>,
    return
  }
  func.func @transform_0(%arg0: i32) -> (i32, i32) {
    %c0_i32 = arith.constant 0 : i32
    %c0_i32_0 = arith.constant 0 : i32
    return %arg0, %c0_i32 : i32, i32
  }
  func.func @transform_1(%arg0: i32) -> (i32, i32) {
    %c0_i32 = arith.constant 0 : i32
    %c0_i32_0 = arith.constant 0 : i32
    return %arg0, %c0_i32 : i32, i32
  }
  func.func @transform_2(%arg0: i32) -> (i32, i32) {
    %c0_i32 = arith.constant 0 : i32
    %c0_i32_0 = arith.constant 0 : i32
    %c0_i32_1 = arith.constant 0 : i32
    return %c0_i32, %c0_i32_0 : i32, i32
  }
  func.func @transform_3(%arg0: i32) -> (i32, i32) {
    %c0_i32 = arith.constant 0 : i32
    %c0_i32_0 = arith.constant 0 : i32
    %c0_i32_1 = arith.constant 0 : i32
    return %c0_i32, %c0_i32_0 : i32, i32
  }
  func.func @transform_4(%arg0: i32) -> (i32, i32) {
    %c0_i32 = arith.constant 0 : i32
    %c0_i32_0 = arith.constant 0 : i32
    %c0_i32_1 = arith.constant 0 : i32
    return %c0_i32, %c0_i32_0 : i32, i32
  }
  func.func @transform_5(%arg0: i32) -> (i32, i32) {
    %c0_i32 = arith.constant 0 : i32
    %c0_i32_0 = arith.constant 0 : i32
    %c0_i32_1 = arith.constant 0 : i32
    return %c0_i32, %c0_i32_0 : i32, i32
  }
  func.func @transform_6(%arg0: i32) -> (i32, i32) {
    %c0_i32 = arith.constant 0 : i32
    %c0_i32_0 = arith.constant 0 : i32
    %c0_i32_1 = arith.constant 0 : i32
    return %c0_i32, %c0_i32_0 : i32, i32
  }
  func.func @transform_7(%arg0: i32) -> (i32, i32) {
    %c0_i32 = arith.constant 0 : i32
    %c0_i32_0 = arith.constant 0 : i32
    %c0_i32_1 = arith.constant 0 : i32
    return %c0_i32, %c0_i32_0 : i32, i32
  }
  func.func @transform_8(%arg0: i32) -> (i32, i32) {
    %c0_i32 = arith.constant 0 : i32
    %c0_i32_0 = arith.constant 0 : i32
    %c0_i32_1 = arith.constant 0 : i32
    return %c0_i32, %c0_i32_0 : i32, i32
  }
  func.func @transform_9(%arg0: i32) -> (i32, i32) {
    %c0_i32 = arith.constant 0 : i32
    %c0_i32_0 = arith.constant 0 : i32
    %c0_i32_1 = arith.constant 0 : i32
    return %c0_i32, %c0_i32_0 : i32, i32
  }
  func.func @transform_10(%arg0: i32) -> (i32, i32) {
    %c0_i32 = arith.constant 0 : i32
    %c0_i32_0 = arith.constant 0 : i32
    return %arg0, %c0_i32 : i32, i32
  }
  func.func @transform_11(%arg0: i32) -> (i32, i32) {
    %c0_i32 = arith.constant 0 : i32
    %c0_i32_0 = arith.constant 0 : i32
    return %arg0, %c0_i32 : i32, i32
  }
}

</mosaic_0001>

<bundles_post_ra>
// kernel: tpu_custom_call.1
= control target key start
LH: loop header
LB: loop body
LE: loop exit
PB: predicated region body
PF: predicated region fallthrough
CT: control target
= control target key end

     0   :  { %s2224_s0 = inlined_call_operand.hbm [shape: bf16[64,128], index: 0, kind: input, shape index: {}]   ;;  %s2225_s1 = inlined_call_operand.hbm [shape: f32[64,128], index: 1, kind: input, shape index: {}]   ;;  %s2226_s2 = inlined_call_operand.hbm [shape: bf16[128,128], index: 2, kind: input, shape index: {}]   ;;  %s2227_s3 = inlined_call_operand.vmem [shape: f32[1,128], index: 3, kind: input, shape index: {}]   ;;  %s2228_s4 = inlined_call_operand.hbm [shape: bf16[128,256], index: 4, kind: input, shape index: {}]   ;;  %s2229_s5 = inlined_call_operand.vmem [shape: f32[1,256], index: 5, kind: input, shape index: {}]   ;;  %s2230_s6 = inlined_call_operand.hbm [shape: bf16[128,128], index: 6, kind: input, shape index: {}]   ;;  %s2231_s7 = inlined_call_operand.vmem [shape: f32[1,128], index: 7, kind: input, shape index: {}]   ;;  %s2232_s8 = inlined_call_operand.hbm [shape: bf16[128,128], index: 8, kind: input, shape index: {}]   ;;  %s2233_s9 = inlined_call_operand.vmem [shape: f32[1,128], index: 9, kind: input, shape index: {}]   ;;  %s2234_s10 = inlined_call_operand.hbm [shape: f32[64,256], index: 10, kind: output, shape index: {0}]   ;;  %s2235_s11 = inlined_call_operand.hbm [shape: bf16[64,128], index: 11, kind: output, shape index: {1}]  }
   0x1   :  { %2248 = sst [smem:[#allocation28_spill]] %s2226_s2 }
   0x2   :  { %2249 = sst [smem:[#allocation29_spill]] %s2228_s4 }
   0x3   :  { %2250 = sst [smem:[#allocation30_spill]] %s2230_s6 }
   0x4   :  { %2251 = sst [smem:[#allocation31_spill]] %s2232_s8 }
   0x5   :  { %2252 = sst [smem:[#allocation32_spill]] %s2235_s11 }
   0x6   :  { %17 = vsyncpa [#allocation3], 0 }
   0x7   :  { %19 = vsyncpa [#allocation3 + $0x1], 0 }
   0x8   :  { %20 = vsyncpa [#allocation6], 0 }
   0x9   :  { %22 = vsyncpa [#allocation6 + $0x1], 0 }
   0xa   :  { %23 = vsyncpa [#allocation9], 0 }
   0xb   :  { %24 = vsyncpa [#allocation12], 0 }
   0xc   :  { %25 = vsyncpa [#allocation4], 0 }
   0xd   :  { %27 = vsyncpa [#allocation4 + $0x1], 0 }
   0xe   :  { %28 = vsyncpa [#allocation15], 0 }
   0xf   :  { %30 = vsyncpa [#allocation15 + $0x1], 0  ;;  %s1956_s17 = smov 0   ;;  %s1958_s18 = smov 0  }
  0x10   :  { %s1960_s19 = smov 0   ;;  %s1962_s20 = smov 0  }
  0x11 LB: > { %2253 = sst [smem:[#allocation23_spill]] %s1870_s17  ;;  %s1977_s21 = sadd.s32 4294967295, %s1882_s20   ;;  %s1882_s20 = sphi %s1962_s20, %s2276_s20   ;;  %s1878_s19 = sphi %s1960_s19, %s2281_s19   ;;  %s1874_s18 = sphi %s1958_s18, %s2280_s18   ;;  %s1870_s17 = sphi %s1956_s17, %s2279_s17  }
  0x12   : > { %2254 = sst [smem:[#allocation24_spill]] %s1878_s19  ;;  %s1207_s22 = sadd.s32 4294967294, %s1882_s20  }
  0x13   : > { %p56_p0 = scmp.ne.s32.totalorder %s1874_s18, %s1870_s17  ;;  %p57_p1 = scmp.eq.s32.totalorder %s1977_s21, 0 }
  0x14   : > { %p274_p2 = scmp.eq.s32.totalorder %s1977_s21, 1  ;;  %p280_p3 = scmp.eq.s32.totalorder %s1207_s22, 1 }
  0x15   : > { %p1986_p4 = por %p57_p1, %p56_p0  ;;  %p1208_p5 = scmp.ge.s32.totalorder %s1882_s20, 1 }
  0x16   : > { %p1991_p6 = por %p280_p3, %p56_p0  ;;  %p313_p7 = scmp.lt.s32.totalorder %s1882_s20, 3 }
  0x17   : > { %s2258_s2 = sld [smem:[#allocation28_spill]]  ;;  %s1884_s29 = smov [#allocation7]  }
  0x18   : > { %s2256_s24 = scalar_select %p1991_p6, 1, 0 }
  0x19   : > { %p1999_p8 = pnand %p1208_p5, %p313_p7  ;;  %s326_s30 = sshll.u32 %s1884_s29, 4  ;;  %s327_s30 = int_to_ptr.vmem [resolvable:$true] %s326_s30 }
  0x1a   : > { %2257 = sst [smem:[#allocation25_spill]] %s2256_s24  ;;  %s2236_s16 = smov 64  }
  0x1b   : > { %p1496_p9 = pneg %p1999_p8  ;;  %s2261_s4 = sld [smem:[#allocation29_spill]] }
  0x1c   : > { %s2238_s22 = smov 4   ;;  %s1887_s25 = smov [#allocation8]  }
  0x1d   : > { %s324_s27 = sshll.u32 %s2258_s2, 4  ;;  %p2007_p10 = pnand %p1496_p9, %p57_p1  ;;  %s325_s27 = int_to_ptr.hbm [resolvable:$true] %s324_s27 }
  0x1e   : > { %s343_s26 = sshll.u32 %s1887_s25, 4  ;;  %s2240_s29 = smov 128   ;;  %s344_s26 = int_to_ptr.vmem [resolvable:$true] %s343_s26 }
  0x1f   : > { %1499 = dma.hbm_to_vmem [thread:$0]  (!%p2007_p10), %s325_s27, 1024, %s327_s30, [#allocation6], %s2236_s16, %s2236_s16, %s2238_s22  }
  0x20   : > { %s2241_s2 = smov 8   ;;  %s2262_s6 = sld [smem:[#allocation30_spill]] }
  0x21   : > { %s341_s15 = sshll.u32 %s2261_s4, 4  ;;  %s1890_s30 = smov [#allocation10]   ;;  %s342_s15 = int_to_ptr.hbm [resolvable:$true] %s341_s15 }
  0x22   : > { %1502 = dma.hbm_to_vmem [thread:$0]  (!%p2007_p10), %s342_s15, 2048, %s344_s26, [#allocation9], %s2240_s29, %s2240_s29, %s2241_s2  }
  0x23   : > { %s360_s25 = sshll.u32 %s1890_s30, 4  ;;  %s2263_s8 = sld [smem:[#allocation31_spill]]  ;;  %s361_s25 = int_to_ptr.vmem [resolvable:$true] %s360_s25 }
  0x24   : > { %s2264_s15 = smov 4   ;;  %s2265_s26 = smov 64  }
  0x25   : > { %s1891_s13 = smov [#allocation11]   ;;  %s2042_s30 = sadd.s32 1, %s1882_s20  }
  0x26   : > { %s358_s27 = sshll.u32 %s2262_s6, 4  ;;  %s377_s14 = sshll.u32 %s1891_s13, 4  ;;  %s359_s27 = int_to_ptr.hbm [resolvable:$true] %s358_s27  ;;  %s378_s14 = int_to_ptr.vmem [resolvable:$true] %s377_s14 }
  0x27   : > { %1505 = dma.hbm_to_vmem [thread:$0]  (!%p2007_p10), %s359_s27, 1024, %s361_s25, [#allocation9], %s2265_s26, %s2265_s26, %s2264_s15  }
  0x28   : > { %2266 = sst [smem:[#allocation26_spill]] %s2042_s30  ;;  %s43_s16 = sadd.s32 1, %s1878_s19 }
  0x29   : > { %s375_s4 = sshll.u32 %s2263_s8, 4  ;;  %s40_s22 = ssub.s32 %s1882_s20, %s2042_s30  ;;  %s376_s4 = int_to_ptr.hbm [resolvable:$true] %s375_s4 }
  0x2a   : > { %1508 = dma.hbm_to_vmem [thread:$0]  (!%p2007_p10), %s376_s4, 1024, %s378_s14, [#allocation12], %s2265_s26, %s2265_s26, %s2264_s15  }
  0x2b   : > { %p50_p12 = scmp.ne.s32.totalorder %s1878_s19, %s1874_s18  ;;  %p41_p13 = scmp.eq.s32.totalorder %s40_s22, 0 }
  0x2c   : > { %p51_p0 = scmp.eq.s32.totalorder %s1882_s20, 0  ;;  %p1527_p5 = scmp.lt.s32.totalorder %s1882_s20, 2 }
  0x2d   : > { %p2052_p3 = por %p274_p2, %p50_p12  ;;  %s2061_s25 = sand.u32 1, %s1878_s19  }
  0x2e   : > { %s2058_s12 = scalar_select %p41_p13, %s1878_s19, %s43_s16  }
  0x2f   : > { %p52_p7 = por %p51_p0, %p50_p12  ;;  %s1214_s4 = sshll.u32 %s2061_s25, 4 }
  0x30   : > { %2268 = sst [smem:[#allocation27_spill]] %s2058_s12  ;;  %s1406_s13 = sshll.u32 %s1882_s20, 4 }
  0x31   : > { %s403_s29 = scalar_lea.hbm %s2224_s0, %s1406_s13  ;;  %s398_s2 = scalar_lea.vmem [#allocation2], %s1214_s4 }
  0x32   : > { %s406_s6 = sshll.u32 %s398_s2, 4  ;;  %s404_s8 = sshll.u32 %s403_s29, 4  ;;  %s407_s6 = int_to_ptr.vmem [resolvable:$true] %s406_s6  ;;  %s405_s8 = int_to_ptr.hbm [resolvable:$true] %s404_s8 }
  0x33   : > { %p2068_p2 = pnand %p1527_p5, %p52_p7  ;;  %s416_s12 = sand.u32 1, %s1882_s20  }
  0x34   : > { %s1217_s19 = sshll.u32 %s2061_s25, 5  ;;  %s395_s30 = scalar_lea.sflag [#allocation3], %s2061_s25 }
  0x35   : > { %s1708_s24 = sshra.s32 %s405_s8, 4  ;;  %p1712_p10 = pneg %p2068_p2  ;;  %s1709_s24 = int_to_ptr.hbm [resolvable:$true] %s1708_s24 }
  0x36   : > { %s1710_s17 = scalar_lea.hbm %s1709_s24, 16  ;;  %s1715_s4 = scalar_lea.hbm %s2224_s0, 32 }
  0x37   : > { %p1711_p9 = scmp.ne.s32.totalorder %s1709_s24, %s1710_s17  ;;  %p1716_p0 = scmp.lt.s32.totalorder %s1709_s24, %s2224_s0 }
  0x38   : > { %p1717_p5 = scmp.lt.s32.totalorder %s1715_s4, %s1710_s17 }
  0x39   : > { %p1713_p12 = pnand %p1712_p10, %p1711_p9 }
  0x3a   : > { %p1718_p7 = por %p1717_p5, %p1716_p0 }
  0x3b   : > { %p1714_p13 = pneg %p1713_p12 }
  0x3d   : > { %p1719_p11 = pnand %p1718_p7, %p1714_p13 }
  0x3f   : > { %1722 = shalt.err (!%p1719_p11)
}
  0x40   : > { %1512 = dma.hbm_to_vmem [thread:$0]  (!%p2068_p2), %s405_s8, 256, %s407_s6, %s395_s30, %s2265_s26, %s2265_s26, %s2264_s15  }
  0x41   : > { %s1407_s25 = sshll.u32 %s1882_s20, 5  ;;  %s420_s11 = scalar_lea.vmem [#allocation5], %s1217_s19 }
  0x42   : > { %s425_s29 = scalar_lea.hbm %s2225_s1, %s1407_s25  ;;  %s428_s13 = sshll.u32 %s420_s11, 4  ;;  %s429_s13 = int_to_ptr.vmem [resolvable:$true] %s428_s13 }
  0x43   : > { %s426_s24 = sshll.u32 %s425_s29, 4  ;;  %s417_s17 = scalar_lea.sflag [#allocation6], %s416_s12  ;;  %s427_s24 = int_to_ptr.hbm [resolvable:$true] %s426_s24 }
  0x44   : > { %s1738_s4 = sshra.s32 %s427_s24, 4  ;;  %s1745_s15 = scalar_lea.hbm %s2225_s1, 64  ;;  %s1739_s4 = int_to_ptr.hbm [resolvable:$true] %s1738_s4 }
  0x45   : > { %s1740_s14 = scalar_lea.hbm %s1739_s4, 32  ;;  %p1746_p13 = scmp.lt.s32.totalorder %s1739_s4, %s2225_s1 }
  0x46   : > { %p1741_p11 = scmp.ne.s32.totalorder %s1739_s4, %s1740_s14  ;;  %p1747_p0 = scmp.lt.s32.totalorder %s1745_s15, %s1740_s14 }
  0x48   : > { %p1743_p9 = pnand %p1741_p11, %p1712_p10  ;;  %p1748_p5 = por %p1747_p0, %p1746_p13 }
  0x4a   : > { %p1744_p12 = pneg %p1743_p9 }
  0x4c   : > { %p1749_p7 = pnand %p1748_p5, %p1744_p12 }
  0x4e   : > { %1752 = shalt.err (!%p1749_p7)
}
  0x4f   : > { %s2270_s11 = smov 8   ;;  %s2271_s19 = smov 128  }
  0x50   : > { %1515 = dma.hbm_to_vmem [thread:$0]  (!%p2068_p2), %s427_s24, 512, %s429_s13, %s417_s17, %s2271_s19, %s2271_s19, %s2270_s11  }
  0x51   : > { %440 = sbr.rel (%p1999_p8) target bundleno = 731 (0x2db), region = 60  ;;  %s2112_s12 = sand.u32 (!%p1999_p8), 1, %s1874_s18  }
  0x52   : > { %s1221_s25 = sshll.u32 (!%p1999_p8), %s2112_s12, 4  ;;  %s443_s22 = scalar_lea.sflag (!%p1999_p8), [#allocation3], %s2112_s12 }
  0x53   : > { %s2118_s2 = scalar_lea.vmem (!%p1999_p8), [#allocation2], %s1221_s25 }
  0x56   : > { %1841 = dma.done.wait (%p1986_p4), %s443_s22, 256  }
  0x57   : > { %1843 = vsyncadd (%p1986_p4), %s443_s22, 4294967040  ;;  %s452_s28 = sand.u32 1, %s1977_s21   ;;  %s1222_s16 = sshll.u32 %s2112_s12, 5 }
  0x58   : > { %s453_s29 = scalar_lea.sflag [#allocation6], %s452_s28  ;;  %s2126_s13 = scalar_lea.vmem [#allocation5], %s1222_s16 }
  0x59   : > { %1845 = dma.done.wait (%p1986_p4), %s453_s29, 512  }
  0x5a   : > { %1847 = vsyncadd (%p1986_p4), %s453_s29, 4294966784 }
  0x5b   : > { %1849 = dma.done.wait (%p57_p1), [#allocation6], 1024  }
  0x5c   : > { %1851 = vsyncadd (%p57_p1), [#allocation6], 4294966272 }
  0x5d   : > { %1853 = dma.done.wait (%p57_p1), [#allocation9], 3072  }
  0x5e   : > { %1855 = vsyncadd (%p57_p1), [#allocation9], 4294964224 }
  0x5f   : > { %1857 = dma.done.wait (%p57_p1), [#allocation12], 1024  }
  0x60   : > { %1859 = vsyncadd (%p57_p1), [#allocation12], 4294966272  ;;  %v1417_v0 = vld [vmem:[#allocation7 + $0x38] sm:$0xff]  ;;  %v1416_v1 = vld [vmem:[#allocation7 + $0x30] sm:$0xff]  ;;  %s1227_s14 = sshll.u32 %s2112_s12, 6  ;;  %s1451_s30 = sshll.u32 %s1977_s21, 6 }
  0x61   : > { %618 = vmatpush.bf16.msra.mxu0 %v1417_v0  ;;  %v1415_v2 = vld [vmem:[#allocation7 + $0x28] sm:$0xff]  ;;  %v1414_v3 = vld [vmem:[#allocation7 + $0x20] sm:$0xff]  ;;  %v1413_v4 = vld [vmem:[#allocation7 + $0x18] sm:$0xff]  ;;  %s2153_s6 = scalar_lea.vmem [#allocation13], %s1227_s14  ;;  %s1019_s22 = scalar_lea.hbm %s2234_s10, %s1451_s30 }
  0x62   : > { %v1412_v5 = vld [vmem:[#allocation7 + $0x10] sm:$0xff]  ;;  %v1433_v7 = vld [vmem:[#allocation8 + $0x74] sm:$0xf0]  ;;  %v1329_v10 = vld [vmem:[#allocation8 + $0x78] sm:$0xf0]  ;;  %s1020_s26 = sshll.u32 %s2153_s6, 4  ;;  %s1021_s26 = int_to_ptr.vmem [resolvable:$true] %s1020_s26 }
  0x63   : > { %v1327_v6 = vld [vmem:[#allocation8 + $0x70] sm:$0xf]  ;;  %v1432_v8 = vld [vmem:[#allocation8 + $0x74] sm:$0xf]  ;;  %v1319_v11 = vld [vmem:[#allocation8 + $0x60] sm:$0xf] }
  0x64   : > { %v1328_v9 = vor.u32 %v1433_v7, %v1327_v6  ;;  %v1431_v12 = vld [vmem:[#allocation8 + $0x64] sm:$0xf0]  ;;  %v1332_v13 = vor.u32 %v1432_v8, %v1329_v10  ;;  %v1430_v14 = vld [vmem:[#allocation8 + $0x64] sm:$0xf]  ;;  %v1321_v15 = vld [vmem:[#allocation8 + $0x68] sm:$0xf0] }
  0x65   : > { %619 = vmatpush.bf16.msra.mxu0 %v1416_v1  ;;  %v1320_v16 = vor.u32 %v1431_v12, %v1319_v11  ;;  %v1324_v17 = vor.u32 %v1430_v14, %v1321_v15  ;;  %v1311_v18 = vld [vmem:[#allocation8 + $0x50] sm:$0xf]  ;;  %v1429_v19 = vld [vmem:[#allocation8 + $0x54] sm:$0xf0]  ;;  %v1411_v20 = vld [vmem:[#allocation7 + $0x8] sm:$0xff]  ;;  %s1002_s28 = scalar_lea.sflag [#allocation4], %s2112_s12 }
  0x66   : > { %745 = vmatpush.bf16.msra.mxu1 %v1328_v9  ;;  %764 = vmatpush.bf16.msra.mxu2 %v1332_v13  ;;  %v1428_v21 = vld [vmem:[#allocation8 + $0x54] sm:$0xf]  ;;  %v1313_v22 = vld [vmem:[#allocation8 + $0x58] sm:$0xf0]  ;;  %v1312_v23 = vor.u32 %v1429_v19, %v1311_v18  ;;  %v1303_v25 = vld [vmem:[#allocation8 + $0x40] sm:$0xf] }
  0x67   : > { %v1316_v24 = vor.u32 %v1428_v21, %v1313_v22  ;;  %v1427_v26 = vld [vmem:[#allocation8 + $0x44] sm:$0xf0]  ;;  %v1410_v27 = vld [vmem:[#allocation7] sm:$0xff]  ;;  %v1305_v29 = vld [vmem:[#allocation8 + $0x48] sm:$0xf0]  ;;  %s1788_s24 = scalar_lea.hbm %s2234_s10, 128 }
  0x68   : > { %v1426_v28 = vld [vmem:[#allocation8 + $0x44] sm:$0xf]  ;;  %v1304_v30 = vor.u32 %v1427_v26, %v1303_v25  ;;  %v1409_v33 = vld [vmem:[%s2118_s2 + $0x8] sm:$0xff]  ;;  %v1295_v34 = vld [vmem:[#allocation8 + $0x30] sm:$0xf] }
  0x69   : > { %620 = vmatpush.bf16.msra.mxu0 %v1415_v2  ;;  %v1408_v31 = vld [vmem:[%s2118_s2] sm:$0xff]  ;;  %v1308_v32 = vor.u32 %v1426_v28, %v1305_v29  ;;  %v1425_v35 = vld [vmem:[#allocation8 + $0x34] sm:$0xf0]  ;;  %v1297_v38 = vld [vmem:[#allocation8 + $0x38] sm:$0xf0]  ;;  %s1022_s2 = sshll.u32 %s1019_s22, 4  ;;  %s1023_s2 = int_to_ptr.hbm [resolvable:$true] %s1022_s2 }
  0x6a   : > { %746 = vmatpush.bf16.msra.mxu1 %v1320_v16  ;;  %765 = vmatpush.bf16.msra.mxu2 %v1324_v17  ;;  %v1424_v36 = vld [vmem:[#allocation8 + $0x34] sm:$0xf]  ;;  %v1296_v37 = vor.u32 %v1425_v35, %v1295_v34  ;;  %v1287_v40 = vld [vmem:[#allocation8 + $0x20] sm:$0xf]  ;;  %v1423_v41 = vld [vmem:[#allocation8 + $0x24] sm:$0xf0] }
  0x6b   : > { %v1300_v39 = vor.u32 %v1424_v36, %v1297_v38  ;;  %v1422_v42 = vld [vmem:[#allocation8 + $0x24] sm:$0xf]  ;;  %v1288_v43 = vor.u32 %v1423_v41, %v1287_v40  ;;  %v1289_v44 = vld [vmem:[#allocation8 + $0x28] sm:$0xf0]  ;;  %v1279_v46 = vld [vmem:[#allocation8 + $0x10] sm:$0xf] }
  0x6c   : > { %v1292_v45 = vor.u32 %v1422_v42, %v1289_v44  ;;  %v1421_v47 = vld [vmem:[#allocation8 + $0x14] sm:$0xf0]  ;;  %v1420_v48 = vld [vmem:[#allocation8 + $0x14] sm:$0xf]  ;;  %v1281_v50 = vld [vmem:[#allocation8 + $0x18] sm:$0xf0] }
  0x6d   : > { %621 = vmatpush.bf16.msra.mxu0 %v1414_v3  ;;  %v1280_v49 = vor.u32 %v1421_v47, %v1279_v46  ;;  %v1284_v51 = vor.u32 %v1420_v48, %v1281_v50  ;;  %v1271_v52 = vld [vmem:[#allocation8] sm:$0xf]  ;;  %v1419_v53 = vld [vmem:[#allocation8 + $0x4] sm:$0xf0]  ;;  %v1418_v54 = vld [vmem:[#allocation8 + $0x4] sm:$0xf] }
  0x6e   : > { %747 = vmatpush.bf16.msra.mxu1 %v1312_v23  ;;  %766 = vmatpush.bf16.msra.mxu2 %v1316_v24  ;;  %v1272_v55 = vor.u32 %v1419_v53, %v1271_v52  ;;  %v1273_v56 = vld [vmem:[#allocation8 + $0x8] sm:$0xf0]  ;;  %v1577_v59 = vld [vmem:[%s2227_s3] ss:$0 sm:$0xff]  ;;  %v1441_v9 = vld [vmem:[#allocation10 + $0x38] sm:$0xff]  ;;  %s1782_s16 = sshra.s32 %s1023_s2, 4  ;;  %s1783_s16 = int_to_ptr.hbm [resolvable:$true] %s1782_s16 }
  0x6f   : > { %v1276_v57 = vor.u32 %v1418_v54, %v1273_v56  ;;  %873 = vmatpush.bf16.msra.mxu3 %v1441_v9  ;;  %v1440_v10 = vld [vmem:[#allocation10 + $0x30] sm:$0xff]  ;;  %v1439_v11 = vld [vmem:[#allocation10 + $0x28] sm:$0xff]  ;;  %v1438_v12 = vld [vmem:[#allocation10 + $0x20] sm:$0xff]  ;;  %s1784_s29 = scalar_lea.hbm %s1783_s16, 64  ;;  %p1789_p2 = scmp.lt.s32.totalorder %s1783_s16, %s2234_s10 }
  0x70   : > { %v1437_v13 = vld [vmem:[#allocation10 + $0x18] sm:$0xff]  ;;  %v1436_v14 = vld [vmem:[#allocation10 + $0x10] sm:$0xff]  ;;  %v1435_v15 = vld [vmem:[#allocation10 + $0x8] sm:$0xff]  ;;  %p1785_p1 = scmp.ne.s32.totalorder %s1783_s16, %s1784_s29  ;;  %p1790_p10 = scmp.lt.s32.totalorder %s1788_s24, %s1784_s29 }
  0x71   : > { %622 = vmatpush.bf16.msra.mxu0 %v1413_v4  ;;  %v659_v16 = vld [vmem:[%s2229_s5] sm:$0x3]  ;;  %v1448_v35 = vld [vmem:[#allocation11 + $0x30] sm:$0xff]  ;;  %v1447_v41 = vld [vmem:[#allocation11 + $0x28] sm:$0xff] }
  0x72   : > { %748 = vmatpush.bf16.msra.mxu1 %v1304_v30  ;;  %767 = vmatpush.bf16.msra.mxu2 %v1308_v32  ;;  %v661_v17 = vperm.slane %v659_v16, 0  ;;  %v1434_v18 = vld [vmem:[#allocation10] sm:$0xff]  ;;  %v662_v21 = vperm.slane %v659_v16, 1  ;;  %v535_v44 = vld [vmem:[%s2126_s13 + $0x8] sm:$0xff]  ;;  %p1786_p4 = pnand %p1785_p1, %p2052_p3  ;;  %p1791_p11 = por %p1790_p10, %p1789_p2 }
  0x73   : > { %874 = vmatpush.bf16.msra.mxu3 %v1440_v10  ;;  %v1446_v48 = vld [vmem:[#allocation11 + $0x20] sm:$0xff] }
  0x74   : > { %p1787_p8 = pneg %p1786_p4 }
  0x75   : > { %623 = vmatpush.bf16.msra.mxu0 %v1412_v5 }
  0x76   : > { %749 = vmatpush.bf16.msra.mxu1 %v1296_v37  ;;  %768 = vmatpush.bf16.msra.mxu2 %v1300_v39  ;;  %v534_v39 = vld [vmem:[%s2126_s13] sm:$0xff]  ;;  %p1792_p9 = pnand %p1791_p11, %p1787_p8 }
  0x77   : > { %875 = vmatpush.bf16.msra.mxu3 %v1439_v11 }
  0x79   : > { %624 = vmatpush.bf16.msra.mxu0 %v1411_v20 }
  0x7a   : > { %750 = vmatpush.bf16.msra.mxu1 %v1288_v43  ;;  %769 = vmatpush.bf16.msra.mxu2 %v1292_v45 }
  0x7b   : > { %876 = vmatpush.bf16.msra.mxu3 %v1438_v12 }
  0x7d   : > { %625 = vmatpush.bf16.msra.mxu0 %v1410_v27 }
  0x7e   : > { %751 = vmatpush.bf16.msra.mxu1 %v1280_v49  ;;  %770 = vmatpush.bf16.msra.mxu2 %v1284_v51 }
  0x7f   : > { %877 = vmatpush.bf16.msra.mxu3 %v1437_v13 }
  0x80   : > { %626 = vmatmul.bf16.vlgmr.msra.gmra.mxu0 %v1408_v31 }
  0x82   : > { %752 = vmatpush.bf16.msra.mxu1 %v1272_v55  ;;  %771 = vmatpush.bf16.msra.mxu2 %v1276_v57 }
  0x83   : > { %878 = vmatpush.bf16.msra.mxu3 %v1436_v14 }
  0x87   : > { %879 = vmatpush.bf16.msra.mxu3 %v1435_v15 }
  0x8b   : > { %880 = vmatpush.bf16.msra.mxu3 %v1434_v18 }
  0x90   : > { %631 = vmatmul.bf16.gmra.mxu0 %v1409_v33  ;;  %v1449_v33 = vld [vmem:[#allocation11 + $0x38] sm:$0xff] }
  0x91   : > { %966 = vmatpush.bf16.msrb.mxu0 %v1449_v33  ;;  %1464 = vmatpush.bf16.msrb.mxu1 %v1449_v33 }
  0x95   : > { %967 = vmatpush.bf16.msrb.mxu0 %v1448_v35  ;;  %1465 = vmatpush.bf16.msrb.mxu1 %v1448_v35 }
  0x99   : > { %968 = vmatpush.bf16.msrb.mxu0 %v1447_v41  ;;  %1466 = vmatpush.bf16.msrb.mxu1 %v1447_v41 }
  0x9d   : > { %969 = vmatpush.bf16.msrb.mxu0 %v1446_v48  ;;  %1467 = vmatpush.bf16.msrb.mxu1 %v1446_v48 }
  0xfd   : > { %v627_v58 = vpop.f32.mrf.mxu0 }
  0xfe   : > { %v628_v60 = vadd.f32 %v1577_v59, %v627_v58  ;;  %v536_v58 = vld [vmem:[%s2126_s13 + $0x10] sm:$0xff] }
 0x100   : > { %v637_v63 = vmax.f32 %v628_v60, 0.0 }
 0x105   : > { %v629_v61 = vpop.f32.mrf.mxu0 }
 0x106   : > { %v630_v62 = vadd.f32 %v1577_v59, %v629_v61 }
 0x108   : > { %v638_v0 = vmax.f32 %v630_v62, 0.0 }
 0x10a   : > { %v641_v1 = vpack.c.bf16 %v638_v0, %v637_v63 }
 0x10c   : > { %753 = vmatmul.bf16.vlgmr.msra.gmra.mxu1 %v641_v1  ;;  %772 = vmatmul.bf16.vlgmr.msra.gmra.mxu2 %v641_v1 }
 0x10d   : > { %v632_v2 = vpop.f32.mrf.mxu0 }
 0x10e   : > { %v633_v3 = vadd.f32 %v1577_v59, %v632_v2  ;;  %v1445_v2 = vld [vmem:[#allocation11 + $0x18] sm:$0xff] }
 0x10f   : > { %970 = vmatpush.bf16.msrb.mxu0 %v1445_v2  ;;  %1468 = vmatpush.bf16.msrb.mxu1 %v1445_v2 }
 0x110   : > { %v639_v6 = vmax.f32 %v633_v3, 0.0  ;;  %v1444_v3 = vld [vmem:[#allocation11 + $0x10] sm:$0xff] }
 0x113   : > { %971 = vmatpush.bf16.msrb.mxu0 %v1444_v3  ;;  %1469 = vmatpush.bf16.msrb.mxu1 %v1444_v3 }
 0x115   : > { %v634_v4 = vpop.f32.mrf.mxu0 }
 0x116   : > { %v635_v5 = vadd.f32 %v1577_v59, %v634_v4  ;;  %v537_v59 = vld [vmem:[%s2126_s13 + $0x18] sm:$0xff]  ;;  %v1443_v4 = vld [vmem:[#allocation11 + $0x8] sm:$0xff] }
 0x117   : > { %972 = vmatpush.bf16.msrb.mxu0 %v1443_v4  ;;  %1470 = vmatpush.bf16.msrb.mxu1 %v1443_v4 }
 0x118   : > { %v640_v7 = vmax.f32 %v635_v5, 0.0  ;;  %v1442_v5 = vld [vmem:[#allocation11] sm:$0xff] }
 0x11a   : > { %v642_v8 = vpack.c.bf16 %v640_v7, %v639_v6  ;;  %v1578_v7 = vld [vmem:[%s2231_s7] ss:$0 sm:$0xff] }
 0x11b   : > { %973 = vmatpush.bf16.msrb.mxu0 %v1442_v5  ;;  %1471 = vmatpush.bf16.msrb.mxu1 %v1442_v5 }
 0x11c   : > { %758 = vmatmul.bf16.gmra.mxu1 %v642_v8  ;;  %777 = vmatmul.bf16.gmra.mxu2 %v642_v8 }
 0x189   : > { %v754_v19 = vpop.f32.mrf.mxu1 }
 0x18a   : > { %v755_v20 = vadd.f32 %v754_v19, %v661_v17 }
 0x18c   : > { %985 = vst [vmem:[%s2153_s6] sm:$0xff] %v755_v20 }
 0x18f   : > { %v773_v22 = vpop.f32.mrf.mxu2 }
 0x190   : > { %v774_v23 = vadd.f32 %v773_v22, %v662_v21 }
 0x191   : > { %v756_v24 = vpop.f32.mrf.mxu1 }
 0x192   : > { %v783_v25 = vmul.f32 0.5, %v774_v23  ;;  %986 = vst [vmem:[%s2153_s6 + $0x8] sm:$0xff] %v774_v23  ;;  %v757_v26 = vadd.f32 %v756_v24, %v661_v17 }
 0x194   : > { %987 = vst [vmem:[%s2153_s6 + $0x10] sm:$0xff] %v757_v26  ;;  %v787_v27 = vmul.f32 1.442695, %v783_v25 }
 0x196   : > { %1580 = vpow2.f32 %v787_v27 }
 0x197   : > { %v775_v28 = vpop.f32.mrf.mxu2 }
 0x198   : > { %v776_v29 = vadd.f32 %v775_v28, %v662_v21 }
 0x199   : > { %v759_v30 = vpop.f32.mrf.mxu1 }
 0x19a   : > { %v784_v31 = vmul.f32 0.5, %v776_v29  ;;  %988 = vst [vmem:[%s2153_s6 + $0x18] sm:$0xff] %v776_v29  ;;  %v760_v32 = vadd.f32 %v759_v30, %v661_v17 }
 0x19c   : > { %v789_v34 = vmul.f32 1.442695, %v784_v31  ;;  %989 = vst [vmem:[%s2153_s6 + $0x20] sm:$0xff] %v760_v32  ;;  %v1581_v37 = vpop.eup %1580 }
 0x19d   : > { %v795_v45 = vmul.f32 %v1581_v37, %v534_v39 }
 0x19e   : > { %1582 = vpow2.f32 %v789_v34 }
 0x19f   : > { %v778_v36 = vpop.f32.mrf.mxu2  ;;  %v799_v51 = vadd.f32 %v795_v45, %v755_v20 }
 0x1a0   : > { %v779_v38 = vadd.f32 %v778_v36, %v662_v21 }
 0x1a1   : > { %v761_v40 = vpop.f32.mrf.mxu1 }
 0x1a2   : > { %v785_v42 = vmul.f32 0.5, %v779_v38  ;;  %990 = vst [vmem:[%s2153_s6 + $0x28] sm:$0xff] %v779_v38  ;;  %v762_v43 = vadd.f32 %v761_v40, %v661_v17 }
 0x1a4   : > { %v1583_v46 = vpop.eup %1582  ;;  %991 = vst [vmem:[%s2153_s6 + $0x30] sm:$0xff] %v762_v43  ;;  %v791_v49 = vmul.f32 1.442695, %v785_v42 }
 0x1a5   : > { %v796_v47 = vmul.f32 %v1583_v46, %v535_v44 }
 0x1a6   : > { %1584 = vpow2.f32 %v791_v49 }
 0x1a7   : > { %v780_v50 = vpop.f32.mrf.mxu2  ;;  %v800_v52 = vadd.f32 %v796_v47, %v757_v26 }
 0x1a8   : > { %v781_v53 = vadd.f32 %v780_v50, %v662_v21 }
 0x1a9   : > { %v803_v54 = vpack.c.bf16 %v800_v52, %v799_v51 }
 0x1aa   : > { %v786_v55 = vmul.f32 0.5, %v781_v53  ;;  %992 = vst [vmem:[%s2153_s6 + $0x38] sm:$0xff] %v781_v53 }
 0x1ab   : > { %881 = vmatmul.bf16.vlgmr.msra.gmra.mxu3 %v803_v54 }
 0x1ac   : > { %v793_v56 = vmul.f32 1.442695, %v786_v55  ;;  %v1585_v57 = vpop.eup %1584 }
 0x1ad   : > { %v797_v60 = vmul.f32 %v1585_v57, %v536_v58 }
 0x1ae   : > { %1586 = vpow2.f32 %v793_v56 }
 0x1af   : > { %v801_v63 = vadd.f32 %v797_v60, %v760_v32 }
 0x1b4   : > { %v1587_v61 = vpop.eup %1586 }
 0x1b5   : > { %v798_v62 = vmul.f32 %v1587_v61, %v537_v59 }
 0x1b7   : > { %v802_v0 = vadd.f32 %v798_v62, %v762_v43 }
 0x1b9   : > { %v804_v1 = vpack.c.bf16 %v802_v0, %v801_v63 }
 0x1bb   : > { %886 = vmatmul.bf16.gmra.mxu3 %v804_v1 }
 0x22e   : > { %v882_v6 = vpop.f32.mrf.mxu3 }
 0x22f   : > { %v883_v8 = vadd.f32 %v1578_v7, %v882_v6 }
 0x231   : > { %v892_v11 = vmax.f32 %v883_v8, 0.0 }
 0x236   : > { %v884_v9 = vpop.f32.mrf.mxu3 }
 0x237   : > { %v885_v10 = vadd.f32 %v1578_v7, %v884_v9 }
 0x239   : > { %v893_v12 = vmax.f32 %v885_v10, 0.0 }
 0x23b   : > { %v896_v13 = vpack.c.bf16 %v893_v12, %v892_v11 }
 0x23d   : > { %974 = vmatmul.bf16.vlgmr.msrb.gmra.mxu0 %v896_v13 }
 0x23e   : > { %v887_v14 = vpop.f32.mrf.mxu3 }
 0x23f   : > { %v888_v15 = vadd.f32 %v1578_v7, %v887_v14 }
 0x241   : > { %v894_v18 = vmax.f32 %v888_v15, 0.0 }
 0x246   : > { %v889_v16 = vpop.f32.mrf.mxu3 }
 0x247   : > { %v890_v17 = vadd.f32 %v1578_v7, %v889_v16 }
 0x249   : > { %v895_v19 = vmax.f32 %v890_v17, 0.0 }
 0x24b   : > { %v897_v20 = vpack.c.bf16 %v895_v19, %v894_v18 }
 0x24d   : > { %979 = vmatmul.bf16.vlgmr.msrb.gmra.mxu1 %v897_v20 }
 0x24e   : > { %1795 = shalt.err (!%p1792_p9)
}
 0x24f   : > { %s1892_s14 = smov 256   ;;  %s1893_s6 = smov 16   ;;  %v1579_v22 = vld [vmem:[%s2233_s9] ss:$0 sm:$0xff] }
 0x250   : > { %1492 = dma.vmem_to_hbm [thread:$0]  (%p2052_p3), %s1021_s26, 1024, %s1023_s2, %s1002_s28, %s1892_s14, %s1892_s14, %s1893_s6  }
 0x251   : > { %s525_s30 = scalar_lea.vmem [#allocation14], %s1221_s25  ;;  %s1452_s11 = sshll.u32 %s1977_s21, 4 }
 0x252   : > { %s2272_s16 = sld [smem:[#allocation32_spill]]  ;;  %s1037_s2 = sshll.u32 %s525_s30, 4  ;;  %s1038_s2 = int_to_ptr.vmem [resolvable:$true] %s1037_s2 }
 0x253   : > { %s1007_s29 = scalar_lea.sflag [#allocation15], %s2112_s12 }
 0x258   : > { %s1036_s26 = scalar_lea.hbm %s2272_s16, %s1452_s11  ;;  %s1816_s24 = scalar_lea.hbm %s2272_s16, 32 }
 0x259   : > { %s1039_s28 = sshll.u32 %s1036_s26, 4  ;;  %s1040_s28 = int_to_ptr.hbm [resolvable:$true] %s1039_s28 }
 0x25a   : > { %s1810_s13 = sshra.s32 %s1040_s28, 4  ;;  %s1811_s13 = int_to_ptr.hbm [resolvable:$true] %s1810_s13 }
 0x25b   : > { %s1812_s25 = scalar_lea.hbm %s1811_s13, 16  ;;  %p1817_p5 = scmp.lt.s32.totalorder %s1811_s13, %s2272_s16 }
 0x25c   : > { %p1813_p12 = scmp.ne.s32.totalorder %s1811_s13, %s1812_s25  ;;  %p1818_p7 = scmp.lt.s32.totalorder %s1816_s24, %s1812_s25 }
 0x25e   : > { %p1814_p13 = pnand %p1813_p12, %p2052_p3  ;;  %p1819_p1 = por %p1818_p7, %p1817_p5 }
 0x260   : > { %p1815_p0 = pneg %p1814_p13 }
 0x262   : > { %p1820_p4 = pnand %p1819_p1, %p1815_p0 }
 0x2ba   : > { %v975_v21 = vpop.f32.mrf.mxu0 }
 0x2bb   : > { %v976_v24 = vadd.f32 %v1579_v22, %v975_v21 }
 0x2c2   : > { %v977_v23 = vpop.f32.mrf.mxu0 }
 0x2c3   : > { %v978_v25 = vadd.f32 %v1579_v22, %v977_v23 }
 0x2c5   : > { %v1456_v26 = vpack.c.bf16 %v978_v25, %v976_v24 }
 0x2c7   : > { %1457 = vst [vmem:[%s525_s30] sm:$0xff] %v1456_v26  }
 0x2ca   : > { %v980_v27 = vpop.f32.mrf.mxu1 }
 0x2cb   : > { %v981_v29 = vadd.f32 %v1579_v22, %v980_v27 }
 0x2d2   : > { %v982_v28 = vpop.f32.mrf.mxu1 }
 0x2d3   : > { %v983_v30 = vadd.f32 %v1579_v22, %v982_v28 }
 0x2d5   : > { %v1461_v31 = vpack.c.bf16 %v983_v30, %v981_v29 }
 0x2d7   : > { %1463 = vst [vmem:[%s525_s30 + $0x8] sm:$0xff] %v1461_v31  }
 0x2d8   : > { %1823 = shalt.err (!%p1820_p4)
}
 0x2d9   : > { %s1894_s12 = smov 64   ;;  %s1895_s14 = smov 4  }
 0x2da   : > { %1493 = dma.vmem_to_hbm [thread:$0]  (%p2052_p3), %s1038_s2, 256, %s1040_s28, %s1007_s29, %s1894_s12, %s1894_s12, %s1895_s14  }
 0x2db PF: > { %s2273_s6 = sld [smem:[#allocation23_spill]]  ;;  %p2275_p8 = scmp.ge.s32.totalorder %s1882_s20, 2 }
 0x2dd   : > { %p1517_p2 = pnand %p2275_p8, %p1991_p6 }
 0x2df   : > { %p1518_p10 = pneg %p1517_p2 }
 0x2e1   : > { %s1054_s15 = sand.u32 1, %s2273_s6  }
 0x2e2   : > { %s1055_s30 = scalar_lea.sflag [#allocation4], %s1054_s15 }
 0x2e3   : > { %1861 = dma.done.wait (%p1518_p10), %s1055_s30, 1024  }
 0x2e4   : > { %1863 = vsyncadd (%p1518_p10), %s1055_s30, 4294966272  ;;  %s1065_s11 = scalar_lea.sflag [#allocation15], %s1054_s15 }
 0x2e5   : > { %1865 = dma.done.wait (%p1518_p10), %s1065_s11, 256  }
 0x2e6   : > { %1867 = vsyncadd (%p1518_p10), %s1065_s11, 4294967040  ;;  %s2276_s20 = sld [smem:[#allocation26_spill]]  ;;  %s2279_s17 = smov %s1874_s18 }
 0x2e7   : > { %s2277_s19 = sld [smem:[#allocation24_spill]] }
 0x2e8   : > { %s2278_s27 = sld [smem:[#allocation27_spill]] }
 0x2ec   : > { %p33_p3 = scmp.ge.s32.totalorder %s2276_s20, 4  }
 0x2ed   : > { %s2280_s18 = smov %s2277_s19 }
 0x2ee   : > { %s2281_s19 = smov %s2278_s27  ;;  %35 = sbr.rel (!%p33_p3) target bundleno = 17 (0x11), region = 151 }
 0x2f3   :  { %1071 = vsyncpa [#allocation3], 1 }
 0x2f4   :  { %1073 = vsyncpa [#allocation3 + $0x1], 1 }
 0x2f5   :  { %1074 = vsyncpa [#allocation6], 1 }
 0x2f6   :  { %1076 = vsyncpa [#allocation6 + $0x1], 1 }
 0x2f7   :  { %1077 = vsyncpa [#allocation9], 1 }
 0x2f8   :  { %1078 = vsyncpa [#allocation12], 1 }
 0x2f9   :  { %1079 = vsyncpa [#allocation4], 1 }
 0x2fa   :  { %1081 = vsyncpa [#allocation4 + $0x1], 1 }
 0x2fb   :  { %1082 = vsyncpa [#allocation15], 1 }
 0x2fc   :  { %1084 = vsyncpa [#allocation15 + $0x1], 1 }

</bundles_post_ra>
